<compile_context>
chip_gen: v5e
topology: v5e:2x2
jax: 0.10.0
libtpu: 0.0.40
codegen_flags: <defaults>
</compile_context>

<pallas_src>
import jax
import jax.numpy as jnp
from jax import lax
from jax.experimental import pallas as pl
from jax.experimental.pallas import tpu as pltpu


def pem_kernel(x_ref, w1_ref, b1_ref, w2_ref, b2_ref, o_ref):
    # fc1 on the MXU (f32 accumulation), bias add + ReLU on the VPU.
    h = jnp.dot(x_ref[...], w1_ref[...], preferred_element_type=jnp.float32)
    h = jnp.maximum(h + b1_ref[...], 0.0)                       # (bn, H)

    # fc2: output width is 1, so contract the hidden dim of h against the fc2
    # weight row and put the batch dim on lanes:  y = W2 (1,H) . h (bn,H)^T.
    # This yields a lane-dense (1, bn) result ready for an unmasked store.
    y = lax.dot_general(
        w2_ref[...], h,
        dimension_numbers=(((1,), (1,)), ((), ())),
        preferred_element_type=jnp.float32)                     # (1, bn)

    # Both 0.1 scales folded here (see header): sigmoid(0.01*y + 0.1*b2).
    o_ref[...] = jax.nn.sigmoid(0.01 * y + 0.1 * b2_ref[...]).astype(o_ref.dtype)


def _round_up(a, m):
    return (a + m - 1) // m * m


def pem_forward(x, w1, b1, w2, b2, *, block_n=2048):
    """PEM forward.

    x  : (N, F)      input features
    w1 : (F, H)      fc1 weight (torch fc1.weight.T)
    b1 : (1, H)      fc1 bias
    w2 : (1, H)      fc2 weight (torch fc2.weight, native layout)
    b2 : (1, 1)      fc2 bias
    returns (N, 1) float32, matching the torch module's output.
    """
    N, F = x.shape
    H = w1.shape[1]
    assert w1.shape == (F, H)
    assert b1.shape == (1, H)
    assert w2.shape == (1, H)
    assert b2.shape == (1, 1)

    # Batch tile: multiple of 128 so the lane-dense output store is unmasked,
    # large enough to amortize per-grid-step overhead, small enough that the
    # double-buffered x tile stays tiny in VMEM on every TPU generation.
    bn = min(block_n, _round_up(N, 128))
    bn = _round_up(bn, 128)
    n_pad = _round_up(N, bn)
    if n_pad != N:
        x = jnp.pad(x, ((0, n_pad - N), (0, 0)))
    grid = (n_pad // bn,)

    out_row = pl.pallas_call(
        pem_kernel,
        out_shape=jax.ShapeDtypeStruct((1, n_pad), jnp.float32),
        grid_spec=pltpu.PrefetchScalarGridSpec(
            num_scalar_prefetch=0,
            grid=grid,
            in_specs=[
                pl.BlockSpec((bn, F), lambda i: (i, 0)),   # x tile (streamed)
                pl.BlockSpec((F, H), lambda i: (0, 0)),    # W1 (resident)
                pl.BlockSpec((1, H), lambda i: (0, 0)),    # b1 (resident)
                pl.BlockSpec((1, H), lambda i: (0, 0)),    # W2 row (resident)
                pl.BlockSpec((1, 1), lambda i: (0, 0)),    # b2 (resident)
            ],
            out_specs=pl.BlockSpec((1, bn), lambda i: (0, i)),
        ),
        compiler_params=pltpu.CompilerParams(
            dimension_semantics=("parallel",)),
    )(x, w1, b1, w2, b2)

    # (1, n_pad) lane-dense row -> (N, 1) column, matching nn.Linear output.
    return out_row.reshape(n_pad, 1)[:N]


if __name__ == "__main__":
    # Small shapes consistent with the module: feat_dim=32, hidden_dim=64,
    # output_dim=1.  N=256 with block_n=128 exercises a 2-step grid; N=200
    # exercises the ragged-batch pad/slice path.
    FEAT, HID = 32, 64

    key = jax.random.PRNGKey(0)
    kx, kw1, kb1, kw2, kb2 = jax.random.split(key, 5)

    # Deterministic synthetic parameter init (the module's reset_params only
    # touches Conv2d layers, so the Linear layers keep a generic dense init).
    w1 = jax.random.normal(kw1, (FEAT, HID), dtype=jnp.float32) * (1.0 / jnp.sqrt(FEAT))
    b1 = jax.random.normal(kb1, (1, HID), dtype=jnp.float32) * 0.01
    w2 = jax.random.normal(kw2, (1, HID), dtype=jnp.float32) * (1.0 / jnp.sqrt(HID))
    b2 = jax.random.normal(kb2, (1, 1), dtype=jnp.float32) * 0.01

    def reference(xin):
        h = jnp.maximum(0.1 * (xin @ w1 + b1), 0.0)
        return jax.nn.sigmoid(0.1 * (h @ w2.T + b2))

    ok = True
    for n, bn in ((256, 128), (200, 128)):
        x = jax.random.normal(kx, (n, FEAT), dtype=jnp.float32)
        out = pem_forward(x, w1, b1, w2, b2, block_n=bn)
        jax.block_until_ready(out)
        ref = reference(x)
        assert out.shape == (n, 1)
        ok &= bool(jnp.allclose(out, ref, atol=1e-5, rtol=1e-5))

    assert ok
    print("KERNEL_OK")
</pallas_src>

<mosaic_0001>
module attributes {stable_mosaic.version = 11 : i64} {
  func.func @pem_kernel(%arg0: i32, %arg1: memref<128x32xf32, #tpu.memory_space<vmem>>, %arg2: memref<32x64xf32, #tpu.memory_space<vmem>>, %arg3: memref<1x64xf32, #tpu.memory_space<vmem>>, %arg4: memref<1x64xf32, #tpu.memory_space<vmem>>, %arg5: memref<1x1xf32, #tpu.memory_space<vmem>>, %arg6: memref<1x128xf32, #tpu.memory_space<vmem>>) attributes {dimension_semantics = [#tpu.dimension_semantics<parallel>], iteration_bounds = array<i64: 2>, scalar_prefetch = 0 : i64, scratch_operands = 0 : i64, tpu.core_type = #tpu.core_type<tc>, window_params = [{transform_indices = @transform_0, window_bounds = array<i64: 128, 32>}, {pipeline_mode = #tpu.pipeline_mode<synchronous>, transform_indices = @transform_1, window_bounds = array<i64: 32, 64>}, {pipeline_mode = #tpu.pipeline_mode<synchronous>, transform_indices = @transform_2, window_bounds = array<i64: 1, 64>}, {pipeline_mode = #tpu.pipeline_mode<synchronous>, transform_indices = @transform_3, window_bounds = array<i64: 1, 64>}, {pipeline_mode = #tpu.pipeline_mode<synchronous>, transform_indices = @transform_4, window_bounds = array<i64: 1, 1>}, {transform_indices = @transform_5, window_bounds = array<i64: 1, 128>}]} {
    %c0 = arith.constant 0 : index
    %c0_0 = arith.constant 0 : index
    %0 = vector.load %arg1[%c0, %c0_0] : memref<128x32xf32, #tpu.memory_space<vmem>>, vector<128x32xf32>
    %c0_1 = arith.constant 0 : index
    %c0_2 = arith.constant 0 : index
    %1 = vector.load %arg2[%c0_1, %c0_2] : memref<32x64xf32, #tpu.memory_space<vmem>>, vector<32x64xf32>
    %cst = arith.constant dense<0.000000e+00> : vector<128x64xf32>
    %2 = tpu.matmul %0, %1, %cst {dimension_numbers = #tpu.dot_dimension_numbers<[1], [0], [0], [1], [0, 0, 1, 1], [], []>} : vector<128x32xf32>, vector<32x64xf32>, vector<128x64xf32> -> vector<128x64xf32>
    %c0_3 = arith.constant 0 : index
    %c0_4 = arith.constant 0 : index
    %3 = vector.load %arg3[%c0_3, %c0_4] : memref<1x64xf32, #tpu.memory_space<vmem>>, vector<1x64xf32>
    %4 = vector.broadcast %3 : vector<1x64xf32> to vector<128x64xf32>
    %5 = arith.addf %2, %4 : vector<128x64xf32>
    %cst_5 = arith.constant 0.000000e+00 : f32
    %6 = vector.broadcast %cst_5 : f32 to vector<128x64xf32>
    %7 = arith.maximumf %5, %6 : vector<128x64xf32>
    %c0_6 = arith.constant 0 : index
    %c0_7 = arith.constant 0 : index
    %8 = vector.load %arg4[%c0_6, %c0_7] : memref<1x64xf32, #tpu.memory_space<vmem>>, vector<1x64xf32>
    %cst_8 = arith.constant dense<0.000000e+00> : vector<1x128xf32>
    %9 = tpu.matmul %8, %7, %cst_8 {dimension_numbers = #tpu.dot_dimension_numbers<[1], [1], [0], [0], [0, 0, 1, 0], [], []>} : vector<1x64xf32>, vector<128x64xf32>, vector<1x128xf32> -> vector<1x128xf32>
    %cst_9 = arith.constant 0.00999999977 : f32
    %10 = vector.broadcast %cst_9 : f32 to vector<1x128xf32>
    %11 = arith.mulf %10, %9 : vector<1x128xf32>
    %c0_10 = arith.constant 0 : index
    %c0_11 = arith.constant 0 : index
    %12 = vector.load %arg5[%c0_10, %c0_11] : memref<1x1xf32, #tpu.memory_space<vmem>>, vector<1x1xf32>
    %cst_12 = arith.constant 1.000000e-01 : f32
    %13 = vector.broadcast %cst_12 : f32 to vector<1x1xf32>
    %14 = arith.mulf %13, %12 : vector<1x1xf32>
    %15 = vector.broadcast %14 : vector<1x1xf32> to vector<1x128xf32>
    %16 = arith.addf %11, %15 : vector<1x128xf32>
    %17 = arith.negf %16 : vector<1x128xf32>
    %18 = math.exp %17 : vector<1x128xf32>
    %cst_13 = arith.constant 1.000000e+00 : f32
    %19 = vector.broadcast %cst_13 : f32 to vector<1x128xf32>
    %20 = arith.addf %19, %18 : vector<1x128xf32>
    %21 = arith.divf %19, %20 : vector<1x128xf32>
    %c0_14 = arith.constant 0 : index
    %c0_15 = arith.constant 0 : index
    %22 = vector.load %arg6[%c0_14, %c0_15] : memref<1x128xf32, #tpu.memory_space<vmem>>, vector<1x128xf32>
    tpu.vector_store %arg6[%c0_14, %c0_15], %21 {strides = array<i32>} : memref<1x128xf32, #tpu.memory_space<vmem>>, vector<1x128xf32>,
    return
  }
  func.func @transform_0(%arg0: i32) -> (i32, i32) {
    %c0_i32 = arith.constant 0 : i32
    %c0_i32_0 = arith.constant 0 : i32
    return %arg0, %c0_i32 : i32, i32
  }
  func.func @transform_1(%arg0: i32) -> (i32, i32) {
    %c0_i32 = arith.constant 0 : i32
    %c0_i32_0 = arith.constant 0 : i32
    %c0_i32_1 = arith.constant 0 : i32
    return %c0_i32, %c0_i32_0 : i32, i32
  }
  func.func @transform_2(%arg0: i32) -> (i32, i32) {
    %c0_i32 = arith.constant 0 : i32
    %c0_i32_0 = arith.constant 0 : i32
    %c0_i32_1 = arith.constant 0 : i32
    return %c0_i32, %c0_i32_0 : i32, i32
  }
  func.func @transform_3(%arg0: i32) -> (i32, i32) {
    %c0_i32 = arith.constant 0 : i32
    %c0_i32_0 = arith.constant 0 : i32
    %c0_i32_1 = arith.constant 0 : i32
    return %c0_i32, %c0_i32_0 : i32, i32
  }
  func.func @transform_4(%arg0: i32) -> (i32, i32) {
    %c0_i32 = arith.constant 0 : i32
    %c0_i32_0 = arith.constant 0 : i32
    %c0_i32_1 = arith.constant 0 : i32
    return %c0_i32, %c0_i32_0 : i32, i32
  }
  func.func @transform_5(%arg0: i32) -> (i32, i32) {
    %c0_i32 = arith.constant 0 : i32
    %c0_i32_0 = arith.constant 0 : i32
    return %c0_i32, %arg0 : i32, i32
  }
}

</mosaic_0001>

<bundles_post_ra>
// kernel: tpu_custom_call.1
= control target key start
LH: loop header
LB: loop body
LE: loop exit
PB: predicated region body
PF: predicated region fallthrough
CT: control target
= control target key end

     0   :  { %s901_s0 = inlined_call_operand.vmem [shape: f32[256,32], index: 0, kind: input, shape index: {}]   ;;  %s902_s1 = inlined_call_operand.vmem [shape: f32[32,64], index: 1, kind: input, shape index: {}]   ;;  %s903_s2 = inlined_call_operand.vmem [shape: f32[1,64], index: 2, kind: input, shape index: {}]   ;;  %s904_s3 = inlined_call_operand.vmem [shape: f32[1,64], index: 3, kind: input, shape index: {}]   ;;  %s905_s4 = inlined_call_operand.<no memory space> [shape: f32[1,1], index: 4, kind: input, shape index: {}]   ;;  %s906_s5 = inlined_call_operand.hbm [shape: f32[1,256], index: 5, kind: output, shape index: {}]  }
   0x1   :  { %v10_v0 = vstv %s905_s4 }
   0x2   :  { %11 = vst [vmem:[#allocation2] sm:$0x1] %v10_v0 }
   0x3   :  { %12 = vsyncpa [#allocation4], 0 }
   0x4   :  { %14 = vsyncpa [#allocation4 + $0x1], 0  ;;  %s745_s20 = smov 0   ;;  %s747_s21 = smov 0  }
   0x5   :  { %s749_s22 = smov 0   ;;  %s751_s23 = smov 0  }
   0x6 LB: > { %s766_s4 = sadd.s32 4294967295, %s709_s23   ;;  %s551_s24 = sadd.s32 4294967294, %s709_s23   ;;  %s709_s23 = sphi %s751_s23, %s912_s23   ;;  %s705_s22 = sphi %s749_s22, %s911_s22   ;;  %s701_s21 = sphi %s747_s21, %s910_s21   ;;  %s697_s20 = sphi %s745_s20, %s909_s20  }
   0x7   : > { %s770_s25 = sadd.s32 1, %s709_s23   ;;  %s137_s26 = sadd.s32 1, %s705_s22 }
   0x8   : > { %s134_s27 = ssub.s32 %s709_s23, %s770_s25  ;;  %p147_p0 = scmp.ne.s32.totalorder %s705_s22, %s701_s21 }
   0x9   : > { %p135_p1 = scmp.eq.s32.totalorder %s134_s27, 0  ;;  %p148_p2 = scmp.eq.s32.totalorder %s766_s4, 1 }
   0xa   : > { %p153_p3 = scmp.ne.s32.totalorder %s701_s21, %s697_s20  ;;  %p154_p4 = scmp.eq.s32.totalorder %s551_s24, 1 }
   0xb   : > { %s781_s28 = scalar_select %p135_p1, %s705_s22, %s137_s26  }
   0xc   : > { %p783_p5 = por %p148_p2, %p147_p0  ;;  %p787_p6 = por %p154_p4, %p153_p3 }
   0xd   : > { %p554_p7 = scmp.ge.s32.totalorder %s709_s23, 1  ;;  %p193_p8 = scmp.lt.s32.totalorder %s709_s23, 3 }
   0xf   : > { %p194_p9 = pnand %p554_p7, %p193_p8 }
  0x10   : > { %s555_s10 = sshll.u32 (!%p194_p9), %s766_s4, 4  ;;  %s218_s6 = sand.u32 (!%p194_p9), 1, %s701_s21  }
  0x11   : > { %197 = sbr.rel (%p194_p9) target bundleno = 414 (0x19e), region = 40  ;;  %p221_p10 = scmp.lt.s32.totalorder (!%p194_p9), %s555_s10, 31 }
  0x12   : > { %s492_s9 = scalar_lea.hbm (!%p194_p9), %s906_s5, %s766_s4  ;;  %s484_s13 = scalar_lea.sflag (!%p194_p9), [#allocation4], %s218_s6 }
  0x13   : > { %s496_s12 = sshll.u32 (!%p194_p9), %s492_s9, 4  ;;  %s667_s17 = scalar_lea.hbm (!%p194_p9), %s906_s5, 2  ;;  %s497_s12 = int_to_ptr.hbm [resolvable:$true] %s496_s12 }
  0x14   : > { %s661_s4 = sshra.s32 (!%p194_p9), %s497_s12, 4  ;;  %s662_s4 = int_to_ptr.hbm [resolvable:$true] %s661_s4 }
  0x15   : > { %s663_s14 = scalar_lea.hbm (!%p194_p9), %s662_s4, 1  ;;  %p668_p0 = scmp.lt.s32.totalorder (!%p194_p9), %s662_s4, %s906_s5 }
  0x16   : > { %v245_v1 = vld [vmem:[%s902_s1 + $0x18] sm:$0xff]  ;;  %v244_v2 = vld [vmem:[%s902_s1 + $0x10] sm:$0xff]  ;;  %v243_v3 = vld [vmem:[%s902_s1 + $0x8] sm:$0xff]  ;;  %s914_s10 = smov (!%p221_p10, %s555_s10), 31  ;;  %vm250_vm0 = vcmask 261120   ;;  %vm381_vm1 = vcmask 523264   ;;  %p664_p11 = scmp.ne.s32.totalorder %s662_s4, %s663_s14 }
  0x17   : > { %593 = vmatpush.msra.mxu2 %v245_v1  ;;  %594 = vmatpush.msra.mxu3 %v245_v1  ;;  %v242_v4 = vld [vmem:[%s902_s1] sm:$0xff]  ;;  %s556_s15 = sshll.u32 %s914_s10, 3  ;;  %v711_v59 = vmov 0   ;;  %s219_s10 = scalar_lea.vmem [#allocation3], %s218_s6 }
  0x18   : > { %311 = vmatpush.msra.mxu0 %v245_v1  ;;  %s809_s18 = scalar_lea.vmem %s901_s0, %s556_s15  ;;  %v642_v29 = vld [vmem:[%s903_s2] ss:$0 sm:$0xff]  ;;  %641 = vset.pattern.permute.xlu0 %v711_v59  ;;  %s494_s11 = sshll.u32 %s219_s10, 4  ;;  %s495_s11 = int_to_ptr.vmem [resolvable:$true] %s494_s11 }
  0x19   : > { %595 = vmatpush.msra.mxu2 %v244_v2  ;;  %596 = vmatpush.msra.mxu3 %v244_v2  ;;  %v232_v5 = vld [vmem:[%s809_s18 + $0x30] sm:$0xff]  ;;  %v238_v6 = vld [vmem:[%s809_s18 + $0x60] sm:$0xff]  ;;  %v233_v8 = vld [vmem:[%s809_s18 + $0x38] sm:$0xff]  ;;  %p665_p12 = pnand %p664_p11, %p783_p5  ;;  %p669_p1 = scmp.lt.s32.totalorder %s667_s17, %s663_s14 }
  0x1a   : > { %312 = vmatpush.msra.mxu0 %v244_v2  ;;  %v226_v7 = vld [vmem:[%s809_s18] sm:$0xff]  ;;  %v239_v9 = vld [vmem:[%s809_s18 + $0x68] sm:$0xff]  ;;  %v240_v12 = vld [vmem:[%s809_s18 + $0x70] sm:$0xff] }
  0x1b   : > { %597 = vmatpush.msra.mxu2 %v243_v3  ;;  %598 = vmatpush.msra.mxu3 %v243_v3  ;;  %v227_v10 = vld [vmem:[%s809_s18 + $0x8] sm:$0xff]  ;;  %v234_v11 = vld [vmem:[%s809_s18 + $0x40] sm:$0xff]  ;;  %v228_v13 = vld [vmem:[%s809_s18 + $0x10] sm:$0xff]  ;;  %p666_p13 = pneg %p665_p12  ;;  %p670_p2 = por %p669_p1, %p668_p0 }
  0x1c   : > { %313 = vmatpush.msra.mxu0 %v243_v3  ;;  %v235_v14 = vld [vmem:[%s809_s18 + $0x48] sm:$0xff]  ;;  %v241_v15 = vld [vmem:[%s809_s18 + $0x78] sm:$0xff]  ;;  %v236_v17 = vld [vmem:[%s809_s18 + $0x50] sm:$0xff] }
  0x1d   : > { %599 = vmatpush.msra.mxu2 %v242_v4  ;;  %600 = vmatpush.msra.mxu3 %v242_v4  ;;  %v229_v16 = vld [vmem:[%s809_s18 + $0x18] sm:$0xff]  ;;  %v230_v18 = vld [vmem:[%s809_s18 + $0x20] sm:$0xff]  ;;  %v231_v20 = vld [vmem:[%s809_s18 + $0x28] sm:$0xff]  ;;  %p671_p3 = pnand %p670_p2, %p666_p13 }
  0x1e   : > { %563 = vmatmul.msk.f32.vlgmr.msra.gmra.mxu2 %vm250_vm0, %v232_v5  ;;  %569 = vmatmul.msk.f32.vlgmr.msra.gmra.mxu3 %vm250_vm0, %v238_v6  ;;  %v237_v19 = vld [vmem:[%s809_s18 + $0x58] sm:$0xff]  ;;  %v454_v57 = vld [vmem:[#allocation2] sm:$0x1] }
  0x1f   : > { %314 = vmatpush.msra.mxu0 %v242_v4  ;;  %v455_v60 = vmul.f32 0.1, %v454_v57 }
  0x20   : > { %557 = vmatmul.msk.f32.vlgmr.msra.gmra.mxu0 %vm250_vm0, %v226_v7 }
  0x21   : > { %458 = vperm.xlu0 %641, %v455_v60  }
  0x26   : > { %564 = vmatmul.msk.f32.gmra.mxu2 %vm250_vm0, %v233_v8  ;;  %570 = vmatmul.msk.f32.gmra.mxu3 %vm250_vm0, %v239_v9  ;;  %v380_v9 = vld [vmem:[%s904_s3] sm:$0x1] }
  0x28   : > { %558 = vmatmul.msk.f32.gmra.mxu0 %vm250_vm0, %v227_v10 }
  0x2e   : > { %565 = vmatmul.msk.f32.gmra.mxu2 %vm250_vm0, %v234_v11  ;;  %571 = vmatmul.msk.f32.gmra.mxu3 %vm250_vm0, %v240_v12 }
  0x30   : > { %559 = vmatmul.msk.f32.gmra.mxu0 %vm250_vm0, %v228_v13 }
  0x36   : > { %566 = vmatmul.msk.f32.gmra.mxu2 %vm250_vm0, %v235_v14  ;;  %572 = vmatmul.msk.f32.gmra.mxu3 %vm250_vm0, %v241_v15 }
  0x38   : > { %560 = vmatmul.msk.f32.gmra.mxu0 %vm250_vm0, %v229_v16 }
  0x3e   : > { %567 = vmatmul.msk.f32.gmra.mxu2 %vm250_vm0, %v236_v17 }
  0x40   : > { %561 = vmatmul.msk.f32.gmra.mxu0 %vm250_vm0, %v230_v18 }
  0x46   : > { %568 = vmatmul.msk.f32.gmra.mxu2 %vm250_vm0, %v237_v19 }
  0x48   : > { %562 = vmatmul.msk.f32.gmra.mxu0 %vm250_vm0, %v231_v20 }
  0x93   : > { %v459_v10 = vpop.permute.xlu0 %458 }
  0x94   : > { %v461_v11 = vperm.slane %v459_v10, 0 }
  0x9d   : > { %v843_v23 = vpop.f32.mrf.mxu0 }
  0x9e   : > { %v317_v6 = vadd.f32 %v642_v29, %v843_v23 }
  0xa0   : > { %v364_v8 = vmax.f32 %v317_v6, 0.0 }
  0xa1   : > { %v334_v21 = vpop.f32.mrf.mxu2  ;;  %v352_v22 = vpop.f32.mrf.mxu3 }
  0xa2   : > { %v353_v39 = vadd.f32 %v642_v29, %v352_v22  ;;  %v335_v55 = vadd.f32 %v642_v29, %v334_v21 }
  0xa4   : > { %v376_v42 = vmax.f32 %v353_v39, 0.0  ;;  %v370_v61 = vmax.f32 %v335_v55, 0.0 }
  0xa5   : > { %v319_v28 = vpop.f32.mrf.mxu0 }
  0xa6   : > { %v320_v4 = vadd.f32 %v642_v29, %v319_v28 }
  0xa8   : > { %v365_v7 = vmax.f32 %v320_v4, 0.0 }
  0xa9   : > { %v337_v24 = vpop.f32.mrf.mxu2  ;;  %v355_v25 = vpop.f32.mrf.mxu3 }
  0xaa   : > { %v356_v36 = vadd.f32 %v642_v29, %v355_v25  ;;  %v338_v52 = vadd.f32 %v642_v29, %v337_v24 }
  0xac   : > { %v377_v40 = vmax.f32 %v356_v36, 0.0  ;;  %v371_v56 = vmax.f32 %v338_v52, 0.0 }
  0xad   : > { %v322_v35 = vpop.f32.mrf.mxu0 }
  0xae   : > { %v323_v2 = vadd.f32 %v642_v29, %v322_v35 }
  0xb0   : > { %v366_v5 = vmax.f32 %v323_v2, 0.0 }
  0xb1   : > { %v340_v26 = vpop.f32.mrf.mxu2  ;;  %v358_v27 = vpop.f32.mrf.mxu3 }
  0xb2   : > { %v359_v33 = vadd.f32 %v642_v29, %v358_v27  ;;  %v341_v50 = vadd.f32 %v642_v29, %v340_v26 }
  0xb4   : > { %v378_v37 = vmax.f32 %v359_v33, 0.0  ;;  %v372_v53 = vmax.f32 %v341_v50, 0.0 }
  0xb5   : > { %v325_v41 = vpop.f32.mrf.mxu0 }
  0xb6   : > { %v326_v0 = vadd.f32 %v642_v29, %v325_v41 }
  0xb8   : > { %v367_v3 = vmax.f32 %v326_v0, 0.0 }
  0xb9   : > { %v343_v30 = vpop.f32.mrf.mxu2  ;;  %v361_v31 = vpop.f32.mrf.mxu3 }
  0xba   : > { %v362_v32 = vadd.f32 %v642_v29, %v361_v31  ;;  %v344_v47 = vadd.f32 %v642_v29, %v343_v30 }
  0xbc   : > { %v379_v34 = vmax.f32 %v362_v32, 0.0  ;;  %v373_v51 = vmax.f32 %v344_v47, 0.0 }
  0xbd   : > { %v328_v49 = vpop.f32.mrf.mxu0 }
  0xbe   : > { %573 = vmatpush.xpose.msk.msra.mxu1 %vm381_vm1, %v379_v34  ;;  %v329_v63 = vadd.f32 %v642_v29, %v328_v49 }
  0xc0   : > { %v368_v1 = vmax.f32 %v329_v63, 0.0 }
  0xc1   : > { %v346_v38 = vpop.f32.mrf.mxu2 }
  0xc2   : > { %574 = vmatpush.xpose.msk.msra.mxu1 %vm381_vm1, %v378_v37  ;;  %v347_v45 = vadd.f32 %v642_v29, %v346_v38 }
  0xc4   : > { %v374_v48 = vmax.f32 %v347_v45, 0.0 }
  0xc5   : > { %v331_v54 = vpop.f32.mrf.mxu0 }
  0xc6   : > { %575 = vmatpush.xpose.msk.msra.mxu1 %vm381_vm1, %v377_v40  ;;  %v332_v58 = vadd.f32 %v642_v29, %v331_v54 }
  0xc8   : > { %v369_v62 = vmax.f32 %v332_v58, 0.0 }
  0xc9   : > { %v349_v43 = vpop.f32.mrf.mxu2 }
  0xca   : > { %v350_v44 = vadd.f32 %v642_v29, %v349_v43  ;;  %576 = vmatpush.xpose.msk.msra.mxu1 %vm381_vm1, %v376_v42 }
  0xcc   : > { %v375_v46 = vmax.f32 %v350_v44, 0.0 }
  0xce   : > { %577 = vmatpush.xpose.msk.msra.mxu1 %vm381_vm1, %v375_v46 }
  0xd2   : > { %578 = vmatpush.xpose.msk.msra.mxu1 %vm381_vm1, %v374_v48 }
  0xd6   : > { %579 = vmatpush.xpose.msk.msra.mxu1 %vm381_vm1, %v373_v51 }
  0xda   : > { %580 = vmatpush.xpose.msk.msra.mxu1 %vm381_vm1, %v372_v53 }
  0xde   : > { %581 = vmatpush.xpose.msk.msra.mxu1 %vm381_vm1, %v371_v56 }
  0xe2   : > { %582 = vmatpush.xpose.msk.msra.mxu1 %vm381_vm1, %v370_v61 }
  0xe6   : > { %583 = vmatpush.xpose.msk.msra.mxu1 %vm381_vm1, %v369_v62 }
  0xea   : > { %584 = vmatpush.xpose.msk.msra.mxu1 %vm381_vm1, %v368_v1 }
  0xee   : > { %585 = vmatpush.xpose.msk.msra.mxu1 %vm381_vm1, %v367_v3 }
  0xf2   : > { %586 = vmatpush.xpose.msk.msra.mxu1 %vm381_vm1, %v366_v5 }
  0xf6   : > { %587 = vmatpush.xpose.msk.msra.mxu1 %vm381_vm1, %v365_v7 }
  0xfa   : > { %588 = vmatpush.xpose.msk.msra.mxu1 %vm381_vm1, %v364_v8 }
  0xfd   : > { %589 = vmatmul.msk.f32.vlgmr.msra.gmra.mxu1 %vm381_vm1, %v380_v9 }
 0x17a   : > { %v450_v12 = vpop.f32.mrf.mxu1 }
 0x17b   : > { %v453_v13 = vmul.f32 0.01, %v450_v12 }
 0x17d   : > { %v462_v14 = vadd.f32 %v461_v11, %v453_v13 }
 0x17f   : > { %v590_v15 = vmul.f32 -1.442695, %v462_v14 }
 0x181   : > { %643 = vpow2.f32 %v590_v15 }
 0x187   : > { %v644_v16 = vpop.eup %643 }
 0x188   : > { %v466_v17 = vadd.f32 1.0, %v644_v16 }
 0x18a   : > { %645 = vrcp.f32 %v466_v17  ;;  %v478_v21 = vand.u32 2147483648, %v466_v17  ;;  %v476_v23 = vand.u32 2147483647, %v466_v17  ;;  %vm472_vm3 = vweird.f32 %v466_v17 }
 0x18c   : > { %v479_v25 = vor.u32 1.1754944e-38, %v478_v21  ;;  %vm477_vm5 = vcmp.eq.f32.partialorder %v476_v23, 8.507059e+37 }
 0x190   : > { %v646_v18 = vpop.eup %645 }
 0x191   : > { %v468_v19 = vmul.f32 %v646_v18, %v466_v17  ;;  %vm473_vm2 = vweird.f32 %v646_v18 }
 0x192   : > { %vm474_vm4 = vmor %vm472_vm3, %vm473_vm2 }
 0x193   : > { %v469_v20 = vsub.f32 1.0, %v468_v19 }
 0x195   : > { %v470_v22 = vmul.f32 %v646_v18, %v469_v20 }
 0x197   : > { %v471_v24 = vadd.f32 %v646_v18, %v470_v22 }
 0x199   : > { %v475_v26 = vsel %vm474_vm4, %v646_v18, %v471_v24 }
 0x19a   : > { %v480_v27 = vsel %vm477_vm5, %v479_v25, %v475_v26 }
 0x19b   : > { %482 = vst [vmem:[%s219_s10] sm:$0x1] %v480_v27 }
 0x19c   : > { %674 = shalt.err (!%p671_p3)
}
 0x19d   : > { %601 = dma.vmem_to_hbm [thread:$0]  (%p783_p5), %s495_s11, 16, %s497_s12, %s484_s13  }
 0x19e PF: > { %p607_p4 = scmp.ge.s32.totalorder %s709_s23, 2  ;;  %s508_s24 = sand.u32 1, %s697_s20  }
 0x19f   : > { %s509_s26 = scalar_lea.sflag [#allocation4], %s508_s24 }
 0x1a0   : > { %p604_p7 = pnand %p607_p4, %p787_p6 }
 0x1a2   : > { %p605_p8 = pneg %p604_p7 }
 0x1a4   : > { %692 = dma.done.wait (%p605_p8), %s509_s26, 16  }
 0x1a5   : > { %694 = vsyncadd (%p605_p8), %s509_s26, 4294967280  ;;  %p17_p9 = scmp.ge.s32.totalorder %s770_s25, 4   ;;  %s909_s20 = smov %s701_s21 }
 0x1a6   : > { %s910_s21 = smov %s705_s22  ;;  %s911_s22 = smov %s781_s28 }
 0x1a7   : > { %s912_s23 = smov %s770_s25  ;;  %19 = sbr.rel (!%p17_p9) target bundleno = 6 (0x6), region = 75 }
 0x1ac   :  { %514 = vsyncpa [#allocation4], 1 }
 0x1ad   :  { %516 = vsyncpa [#allocation4 + $0x1], 1 }

</bundles_post_ra>
